<compile_context>
chip_gen: v7x
topology: tpu7x:2x2x1
jax: 0.10.0
libtpu: 0.0.40
codegen_flags: <defaults>
</compile_context>

<pallas_src>
import jax
import jax.numpy as jnp
from jax.experimental import pallas as pl
from jax.experimental.pallas import tpu as pltpu


# ----------------------------------------------------------------------------
# small helpers
# ----------------------------------------------------------------------------
def _round_up(a: int, b: int) -> int:
    return ((a + b - 1) // b) * b


def _device_kind() -> str:
    try:
        return jax.devices()[0].device_kind.lower()
    except Exception:
        return ""


def _vmem_capacity_bytes() -> int:
    try:
        cap = int(pltpu.get_tpu_info().vmem_capacity_bytes)
        if cap > 0:
            return cap
    except Exception:
        pass
    if "v7" in _device_kind():
        return 64 << 20
    return 128 << 20


def _vmem_estimate(tm, tk, dffp, dmp, is_gated, csz, osz, wbuf=2):
    """Conservative VMEM footprint: pipelined blocks + accumulator + in-kernel
    f32 temporaries (h / hv, ReLU/gate products) + Mosaic scratch headroom."""
    del dffp  # per-step estimate; dffp only enters via tk when weights resident
    wcols = 2 * tk if is_gated else tk
    est = 0
    est += 2 * tm * dmp * csz          # x blocks (double-buffered)
    est += wbuf * dmp * wcols * csz    # W1 (/ W1||Wv) blocks
    est += wbuf * wcols * 4            # b1 (/ b1||bv) blocks, f32
    est += wbuf * tk * dmp * csz       # W2 blocks
    est += wbuf * dmp * 4              # b2 blocks, f32
    est += 2 * tm * dmp * osz          # out blocks
    est += tm * dmp * 4                # f32 accumulator scratch
    est += tm * wcols * 4              # f32 h / hv intermediate
    est += tm * wcols * 4              # ReLU / gate / cast temporaries margin
    est += tm * tk * csz               # g / z in compute dtype
    est += 2 << 20                     # Mosaic internal scratch headroom
    return est


def _ffn_config(d_model, d_ff, is_gated, compute_dtype, out_itemsize):
    """Pick (dffp, tk, tm_cap, vmem budget) per TPU generation."""
    dmp = _round_up(d_model, 128)
    dffp_min = _round_up(d_ff, 128)
    csz = jnp.dtype(compute_dtype).itemsize
    kind = _device_kind()
    cap = _vmem_capacity_bytes()
    # ~100 MiB on 128 MiB parts (v5e/v6e), ~52 MiB on 64 MiB parts (v7x).
    budget = (100 << 20) if cap >= (128 << 20) else int(cap * 0.82)
    # v5e is already near roofline balance at tm~256; v6e/v7x want bigger rows.
    tm_target = 256 if ("v5 lite" in kind or "v5e" in kind) else 512
    tm_cands = sorted({tm_target, 256, 128}, reverse=True)

    # 1) Prefer weight residency (nk == 1): grid-constant weight BlockSpecs,
    #    so the weights are DMA'd exactly once for the whole grid.
    for tm_cap in tm_cands:
        if _vmem_estimate(tm_cap, dffp_min, dffp_min, dmp, is_gated,
                          csz, out_itemsize) <= budget:
            return dict(dmp=dmp, dffp=dffp_min, tk=dffp_min, tm_cap=tm_cap,
                        budget=budget, wbuf=2)

    # 2) Streamed weights: tk a multiple of 256 (for the 256x256 MXUs on
    #    v6e/v7x), padding d_ff up to a tk multiple (zero padding is
    #    math-preserving through ReLU / gate / final slice).
    for tk in (512, 256, 128):
        dffp = _round_up(d_ff, tk)
        if dffp > int(dffp_min * 1.25):
            continue  # bound d_ff padding waste
        for tm_cap in tm_cands:
            if _vmem_estimate(tm_cap, tk, dffp, dmp, is_gated,
                              csz, out_itemsize) <= budget:
                wbuf = 2
                if dffp // tk >= 3 and _vmem_estimate(
                        tm_cap, tk, dffp, dmp, is_gated,
                        csz, out_itemsize, wbuf=3) <= budget:
                    wbuf = 3  # deeper buffering on short streamed k-steps
                return dict(dmp=dmp, dffp=dffp, tk=tk, tm_cap=tm_cap,
                            budget=budget, wbuf=wbuf)

    # 3) Fallback: smallest tiles.
    return dict(dmp=dmp, dffp=dffp_min, tk=128, tm_cap=128,
                budget=budget, wbuf=2)


def _choose_tm(n, tm_cap):
    """Row tile: <= tm_cap, >=2 tiles when rows permit, bounded padding."""
    n = max(int(n), 1)
    tm_cap = max(16, _round_up(tm_cap, 16))
    tiles = -(-n // tm_cap) if n >= tm_cap else 1
    # Keep >= 2 row tiles for the two v7x TensorCores when rows allow.
    if tiles == 1 and n > 128:
        tiles = 2
    tm = _round_up(-(-n // tiles), 16)
    # Bound row-padding waste (~15%) without shrinking tiles below 64 rows.
    for _ in range(8):
        if tiles * tm <= max(n + 16, int(n * 1.15)) or tm <= 64:
            break
        tiles += 1
        tm = _round_up(-(-n // tiles), 16)
    return tm, tiles * tm


# ----------------------------------------------------------------------------
# kernels
# ----------------------------------------------------------------------------
def _ffn_kernel(x_ref, w1_ref, b1_ref, w2_ref, b2_ref, o_ref, acc_ref):
    """grid = (row_tiles, k_tiles over d_ff); output/acc resident across k."""
    k = pl.program_id(1)

    @pl.when(k == 0)
    def _():
        acc_ref[...] = jnp.zeros_like(acc_ref)

    x = x_ref[...]
    # The first matmul's reduction (d_model) completes within this k-step, so
    # adding the per-tile b1 slice here is correct and happens exactly once.
    h = jnp.dot(x, w1_ref[...], preferred_element_type=jnp.float32) + b1_ref[...]
    g = jnp.maximum(h, 0.0).astype(x.dtype)  # ReLU, back to compute dtype
    acc_ref[...] += jnp.dot(g, w2_ref[...], preferred_element_type=jnp.float32)

    @pl.when(k == pl.num_programs(1) - 1)
    def _():
        # TODO(synk): dropout is identity in eval mode; training-mode dropout
        # with a PyTorch-matching RNG stream is not reproduced here.
        o_ref[...] = (acc_ref[...] + b2_ref[...]).astype(o_ref.dtype)


def _ffn_gated_kernel(x_ref, w1v_ref, b1v_ref, w2_ref, b2_ref, o_ref, acc_ref):
    """Gated variant: W1 and Wv interleaved per k-tile -> one 2x-wide MXU call."""
    k = pl.program_id(1)
    tk = w2_ref.shape[0]  # static block size of the d_ff tile

    @pl.when(k == 0)
    def _():
        acc_ref[...] = jnp.zeros_like(acc_ref)

    x = x_ref[...]
    hv = jnp.dot(x, w1v_ref[...], preferred_element_type=jnp.float32) + b1v_ref[...]
    g = jnp.maximum(hv[:, :tk], 0.0)  # ReLU branch (x @ W1 + b1)
    v = hv[:, tk:]                    # gate branch (x @ Wv + bv)
    z = (g * v).astype(x.dtype)
    acc_ref[...] += jnp.dot(z, w2_ref[...], preferred_element_type=jnp.float32)

    @pl.when(k == pl.num_programs(1) - 1)
    def _():
        o_ref[...] = (acc_ref[...] + b2_ref[...]).astype(o_ref.dtype)


# ----------------------------------------------------------------------------
# host-side wrappers
# ----------------------------------------------------------------------------
def prepare_params(params, *, is_gated=False, compute_dtype=jnp.bfloat16,
                   out_dtype=jnp.float32, tk=None, tm_cap=None):
    """One-time weight preprocessing: pad / cast / interleave, cached.

    Call this once and reuse the returned dict for every forward call so the
    per-call path carries zero weight-sized XLA ops (no re-pad / re-cast /
    re-interleave). `tk` / `tm_cap` are optional overrides for tuning/tests.
    """
    if isinstance(params, dict) and params.get("_prepared", False):
        return params
    d_model, d_ff = params["w1"].shape
    cfg = _ffn_config(d_model, d_ff, is_gated, compute_dtype,
                      jnp.dtype(out_dtype).itemsize)
    if tk is not None:
        cfg["tk"] = int(tk)
        cfg["dffp"] = _round_up(d_ff, int(tk))
    if tm_cap is not None:
        cfg["tm_cap"] = int(tm_cap)
    dmp, dffp, tkc = cfg["dmp"], cfg["dffp"], cfg["tk"]
    nk = dffp // tkc

    w1p = jnp.pad(params["w1"], ((0, dmp - d_model), (0, dffp - d_ff))
                  ).astype(compute_dtype)
    b1p = jnp.pad(params["b1"], ((0, 0), (0, dffp - d_ff))).astype(jnp.float32)
    w2p = jnp.pad(params["w2"], ((0, dffp - d_ff), (0, dmp - d_model))
                  ).astype(compute_dtype)
    b2p = jnp.pad(params["b2"], ((0, 0), (0, dmp - d_model))).astype(jnp.float32)
    if is_gated:
        wvp = jnp.pad(params["wv"], ((0, dmp - d_model), (0, dffp - d_ff))
                      ).astype(compute_dtype)
        bvp = jnp.pad(params["bv"], ((0, 0), (0, dffp - d_ff))).astype(jnp.float32)
        # Interleave W1 / Wv per d_ff tile so one (dmp, 2*tk) block feeds one
        # wide MXU call whose halves are the ReLU and gate branches.
        w1p = jnp.concatenate(
            [w1p.reshape(dmp, nk, tkc), wvp.reshape(dmp, nk, tkc)], axis=-1
        ).reshape(dmp, nk * 2 * tkc)
        b1p = jnp.concatenate(
            [b1p.reshape(1, nk, tkc), bvp.reshape(1, nk, tkc)], axis=-1
        ).reshape(1, nk * 2 * tkc)

    # Materialize now so nothing weight-sized runs on the per-call path.
    w1p, b1p, w2p, b2p = jax.block_until_ready((w1p, b1p, w2p, b2p))
    return {"_prepared": True, "is_gated": is_gated,
            "compute_dtype": compute_dtype,
            "d_model": d_model, "d_ff": d_ff, **cfg,
            "w1": w1p, "b1": b1p, "w2": w2p, "b2": b2p}


def feed_forward_pallas(x, params, *, is_gated=False,
                        compute_dtype=jnp.bfloat16):
    """x: (..., d_model). `params` is either raw (init_params) or prepared."""
    if not (isinstance(params, dict) and params.get("_prepared", False)):
        params = prepare_params(params, is_gated=is_gated,
                                compute_dtype=compute_dtype, out_dtype=x.dtype)
    p = params
    is_gated = p["is_gated"]
    compute_dtype = p["compute_dtype"]
    d_model = p["d_model"]
    assert x.shape[-1] == d_model

    orig_dtype = x.dtype
    lead = x.shape[:-1]
    x2d = x.reshape(-1, d_model)
    n = x2d.shape[0]

    dmp, dffp, tk = p["dmp"], p["dffp"], p["tk"]
    nk = dffp // tk
    wcols = 2 * tk if is_gated else tk
    tm, n_pad = _choose_tm(n, p["tm_cap"])

    # Activations only: pad rows/features and cast (weights already prepared).
    xp = x2d
    if n_pad != n or dmp != d_model:
        xp = jnp.pad(x2d, ((0, n_pad - n), (0, dmp - d_model)))
    xp = xp.astype(compute_dtype)

    row_spec = pl.BlockSpec((tm, dmp), lambda i, k: (i, 0))
    out_spec = pl.BlockSpec((tm, dmp), lambda i, k: (i, 0))
    b1_spec = pl.BlockSpec((1, wcols), lambda i, k: (0, k))
    b2_spec = pl.BlockSpec((1, dmp), lambda i, k: (0, 0))
    w1_spec = pl.BlockSpec((dmp, wcols), lambda i, k: (0, k))
    w2_spec = pl.BlockSpec((tk, dmp), lambda i, k: (k, 0))
    if nk > 1 and p.get("wbuf", 2) > 2:
        # Deeper buffering on the streamed weight slabs hides DMA issue latency.
        w1_spec = pl.BlockSpec((dmp, wcols), lambda i, k: (0, k),
                               pipeline_mode=pl.Buffered(p["wbuf"]))
        w2_spec = pl.BlockSpec((tk, dmp), lambda i, k: (k, 0),
                               pipeline_mode=pl.Buffered(p["wbuf"]))

    kernel = _ffn_gated_kernel if is_gated else _ffn_kernel

    csz = jnp.dtype(compute_dtype).itemsize
    osz = jnp.dtype(orig_dtype).itemsize
    est = _vmem_estimate(tm, tk, dffp, dmp, is_gated, csz, osz,
                         wbuf=p.get("wbuf", 2))
    vmem_limit = int(max(min(p["budget"], est + (8 << 20)), est))

    out = pl.pallas_call(
        kernel,
        out_shape=jax.ShapeDtypeStruct((n_pad, dmp), orig_dtype),
        grid_spec=pltpu.PrefetchScalarGridSpec(
            num_scalar_prefetch=0,
            grid=(n_pad // tm, nk),                    # reduction axis last
            in_specs=[row_spec, w1_spec, b1_spec, w2_spec, b2_spec],
            out_specs=out_spec,
            scratch_shapes=[pltpu.VMEM((tm, dmp), jnp.float32)],
        ),
        compiler_params=pltpu.CompilerParams(
            dimension_semantics=("parallel", "arbitrary"),
            vmem_limit_bytes=vmem_limit,
        ),
    )(xp, p["w1"], p["b1"], p["w2"], p["b2"])

    return out[:n, :d_model].reshape(*lead, d_model)


# ----------------------------------------------------------------------------
# reference / init
# ----------------------------------------------------------------------------
def init_params(key, d_model, d_ff, is_gated=False, dtype=jnp.float32):
    """PyTorch-style uniform(-1/sqrt(fan_in), 1/sqrt(fan_in)) init (transposed)."""
    ks = jax.random.split(key, 6)
    lim1 = 1.0 / jnp.sqrt(d_model)
    lim2 = 1.0 / jnp.sqrt(d_ff)
    params = {
        "w1": jax.random.uniform(ks[0], (d_model, d_ff), dtype, -lim1, lim1),
        "b1": jax.random.uniform(ks[1], (1, d_ff), dtype, -lim1, lim1),
        "w2": jax.random.uniform(ks[2], (d_ff, d_model), dtype, -lim2, lim2),
        "b2": jax.random.uniform(ks[3], (1, d_model), dtype, -lim2, lim2),
    }
    if is_gated:
        params["wv"] = jax.random.uniform(ks[4], (d_model, d_ff), dtype, -lim1, lim1)
        params["bv"] = jax.random.uniform(ks[5], (1, d_ff), dtype, -lim1, lim1)
    return params


def feed_forward_ref(x, params, *, is_gated=False):
    g = jnp.maximum(x @ params["w1"] + params["b1"][0], 0.0)
    if is_gated:
        g = g * (x @ params["wv"] + params["bv"][0])
    return g @ params["w2"] + params["b2"][0]


if __name__ == "__main__":
    key = jax.random.PRNGKey(0)

    # ---- case 1: small default shapes (weight-resident nk == 1 path) -------
    d_model, d_ff, batch, seq = 32, 64, 2, 8
    kx, kp, kpg = jax.random.split(key, 3)
    x = jax.random.normal(kx, (batch, seq, d_model), jnp.float32)

    params = init_params(kp, d_model, d_ff, is_gated=False)
    pp = prepare_params(params, is_gated=False)          # hoisted preprocessing
    out = jax.block_until_ready(feed_forward_pallas(x, pp))
    ref = feed_forward_ref(x, params, is_gated=False)
    assert out.shape == x.shape and out.dtype == x.dtype
    assert jnp.allclose(out, ref, atol=5e-2, rtol=5e-2)

    # exact-math check of the kernel structure (f32 compute path)
    pp32 = prepare_params(params, is_gated=False, compute_dtype=jnp.float32)
    out32 = jax.block_until_ready(feed_forward_pallas(x, pp32))
    assert jnp.allclose(out32, ref, atol=1e-5, rtol=1e-5)

    # gated variant
    params_g = init_params(kpg, d_model, d_ff, is_gated=True)
    ppg = prepare_params(params_g, is_gated=True)
    out_g = jax.block_until_ready(feed_forward_pallas(x, ppg))
    ref_g = feed_forward_ref(x, params_g, is_gated=True)
    assert jnp.allclose(out_g, ref_g, atol=5e-2, rtol=5e-2)

    # ---- case 2: exercise the streamed-weight path (nk > 1) and multiple ---
    # ---- row tiles, with row padding (n not a tile multiple) ---------------
    d_model2, d_ff2, batch2, seq2 = 128, 384, 4, 45      # n = 180 rows
    k2x, k2p = jax.random.split(jax.random.PRNGKey(1))
    x2 = jax.random.normal(k2x, (batch2, seq2, d_model2), jnp.float32)
    params2 = init_params(k2p, d_model2, d_ff2, is_gated=True)
    ref2 = feed_forward_ref(x2, params2, is_gated=True)

    pp2 = prepare_params(params2, is_gated=True, tk=128, tm_cap=64)  # nk = 3
    out2 = jax.block_until_ready(feed_forward_pallas(x2, pp2))
    assert out2.shape == x2.shape
    assert jnp.allclose(out2, ref2, atol=5e-2, rtol=5e-2)

    pp2_32 = prepare_params(params2, is_gated=True, compute_dtype=jnp.float32,
                            tk=128, tm_cap=64)
    out2_32 = jax.block_until_ready(feed_forward_pallas(x2, pp2_32))
    assert jnp.allclose(out2_32, ref2, atol=1e-5, rtol=1e-5)

    print("KERNEL_OK")
</pallas_src>

<mosaic_0001>
module attributes {stable_mosaic.version = 11 : i64} {
  func.func @_ffn_kernel(%arg0: i32, %arg1: i32, %arg2: memref<16x128xbf16, #tpu.memory_space<vmem>>, %arg3: memref<128x128xbf16, #tpu.memory_space<vmem>>, %arg4: memref<1x128xf32, #tpu.memory_space<vmem>>, %arg5: memref<128x128xbf16, #tpu.memory_space<vmem>>, %arg6: memref<1x128xf32, #tpu.memory_space<vmem>>, %arg7: memref<16x128xf32, #tpu.memory_space<vmem>>, %arg8: memref<16x128xf32, #tpu.memory_space<vmem>>) attributes {dimension_semantics = [#tpu.dimension_semantics<parallel>, #tpu.dimension_semantics<arbitrary>], iteration_bounds = array<i64: 1, 1>, scalar_prefetch = 0 : i64, scratch_operands = 1 : i64, tpu.core_type = #tpu.core_type<tc>, window_params = [{transform_indices = @transform_0, window_bounds = array<i64: 16, 128>}, {transform_indices = @transform_1, window_bounds = array<i64: 128, 128>}, {transform_indices = @transform_2, window_bounds = array<i64: 1, 128>}, {transform_indices = @transform_3, window_bounds = array<i64: 128, 128>}, {pipeline_mode = #tpu.pipeline_mode<synchronous>, transform_indices = @transform_4, window_bounds = array<i64: 1, 128>}, {transform_indices = @transform_5, window_bounds = array<i64: 16, 128>}]} {
    %c0_i32 = arith.constant 0 : i32
    %0 = arith.cmpi eq, %arg1, %c0_i32 : i32
    %1 = arith.extui %0 : i1 to i32
    %c0_i32_0 = arith.constant 0 : i32
    %2 = arith.cmpi ne, %1, %c0_i32_0 : i32
    scf.if %2 {
      %cst_16 = arith.constant 0.000000e+00 : f32
      %20 = vector.broadcast %cst_16 : f32 to vector<16x128xf32>
      %c0_17 = arith.constant 0 : index
      %c0_18 = arith.constant 0 : index
      %21 = vector.load %arg8[%c0_17, %c0_18] : memref<16x128xf32, #tpu.memory_space<vmem>>, vector<16x128xf32>
      tpu.vector_store %arg8[%c0_17, %c0_18], %20 {strides = array<i32>} : memref<16x128xf32, #tpu.memory_space<vmem>>, vector<16x128xf32>,
    } else {
    }
    %c0 = arith.constant 0 : index
    %c0_1 = arith.constant 0 : index
    %3 = vector.load %arg2[%c0, %c0_1] : memref<16x128xbf16, #tpu.memory_space<vmem>>, vector<16x128xbf16>
    %c0_2 = arith.constant 0 : index
    %c0_3 = arith.constant 0 : index
    %4 = vector.load %arg3[%c0_2, %c0_3] : memref<128x128xbf16, #tpu.memory_space<vmem>>, vector<128x128xbf16>
    %cst = arith.constant dense<0.000000e+00> : vector<16x128xf32>
    %5 = tpu.matmul %3, %4, %cst {dimension_numbers = #tpu.dot_dimension_numbers<[1], [0], [0], [1], [0, 0, 1, 1], [], []>} : vector<16x128xbf16>, vector<128x128xbf16>, vector<16x128xf32> -> vector<16x128xf32>
    %c0_4 = arith.constant 0 : index
    %c0_5 = arith.constant 0 : index
    %6 = vector.load %arg4[%c0_4, %c0_5] : memref<1x128xf32, #tpu.memory_space<vmem>>, vector<1x128xf32>
    %7 = vector.broadcast %6 : vector<1x128xf32> to vector<16x128xf32>
    %8 = arith.addf %5, %7 : vector<16x128xf32>
    %cst_6 = arith.constant 0.000000e+00 : f32
    %9 = vector.broadcast %cst_6 : f32 to vector<16x128xf32>
    %10 = arith.maximumf %8, %9 : vector<16x128xf32>
    %11 = arith.truncf %10 : vector<16x128xf32> to vector<16x128xbf16>
    %c0_7 = arith.constant 0 : index
    %c0_8 = arith.constant 0 : index
    %12 = vector.load %arg8[%c0_7, %c0_8] : memref<16x128xf32, #tpu.memory_space<vmem>>, vector<16x128xf32>
    %c0_9 = arith.constant 0 : index
    %c0_10 = arith.constant 0 : index
    %13 = vector.load %arg5[%c0_9, %c0_10] : memref<128x128xbf16, #tpu.memory_space<vmem>>, vector<128x128xbf16>
    %cst_11 = arith.constant dense<0.000000e+00> : vector<16x128xf32>
    %14 = tpu.matmul %11, %13, %cst_11 {dimension_numbers = #tpu.dot_dimension_numbers<[1], [0], [0], [1], [0, 0, 1, 1], [], []>} : vector<16x128xbf16>, vector<128x128xbf16>, vector<16x128xf32> -> vector<16x128xf32>
    %15 = arith.addf %12, %14 : vector<16x128xf32>
    %c0_12 = arith.constant 0 : index
    %c0_13 = arith.constant 0 : index
    %16 = vector.load %arg8[%c0_12, %c0_13] : memref<16x128xf32, #tpu.memory_space<vmem>>, vector<16x128xf32>
    tpu.vector_store %arg8[%c0_12, %c0_13], %15 {strides = array<i32>} : memref<16x128xf32, #tpu.memory_space<vmem>>, vector<16x128xf32>,
    %c0_i32_14 = arith.constant 0 : i32
    %17 = arith.cmpi eq, %arg1, %c0_i32_14 : i32
    %18 = arith.extui %17 : i1 to i32
    %c0_i32_15 = arith.constant 0 : i32
    %19 = arith.cmpi ne, %18, %c0_i32_15 : i32
    scf.if %19 {
      %c0_16 = arith.constant 0 : index
      %c0_17 = arith.constant 0 : index
      %20 = vector.load %arg8[%c0_16, %c0_17] : memref<16x128xf32, #tpu.memory_space<vmem>>, vector<16x128xf32>
      %c0_18 = arith.constant 0 : index
      %c0_19 = arith.constant 0 : index
      %21 = vector.load %arg6[%c0_18, %c0_19] : memref<1x128xf32, #tpu.memory_space<vmem>>, vector<1x128xf32>
      %22 = vector.broadcast %21 : vector<1x128xf32> to vector<16x128xf32>
      %23 = arith.addf %20, %22 : vector<16x128xf32>
      %c0_20 = arith.constant 0 : index
      %c0_21 = arith.constant 0 : index
      %24 = vector.load %arg7[%c0_20, %c0_21] : memref<16x128xf32, #tpu.memory_space<vmem>>, vector<16x128xf32>
      tpu.vector_store %arg7[%c0_20, %c0_21], %23 {strides = array<i32>} : memref<16x128xf32, #tpu.memory_space<vmem>>, vector<16x128xf32>,
    } else {
    }
    return
  }
  func.func @transform_0(%arg0: i32, %arg1: i32) -> (i32, i32) {
    %c0_i32 = arith.constant 0 : i32
    %c0_i32_0 = arith.constant 0 : i32
    return %arg0, %c0_i32 : i32, i32
  }
  func.func @transform_1(%arg0: i32, %arg1: i32) -> (i32, i32) {
    %c0_i32 = arith.constant 0 : i32
    %c0_i32_0 = arith.constant 0 : i32
    return %c0_i32, %arg1 : i32, i32
  }
  func.func @transform_2(%arg0: i32, %arg1: i32) -> (i32, i32) {
    %c0_i32 = arith.constant 0 : i32
    %c0_i32_0 = arith.constant 0 : i32
    return %c0_i32, %arg1 : i32, i32
  }
  func.func @transform_3(%arg0: i32, %arg1: i32) -> (i32, i32) {
    %c0_i32 = arith.constant 0 : i32
    %c0_i32_0 = arith.constant 0 : i32
    return %arg1, %c0_i32 : i32, i32
  }
  func.func @transform_4(%arg0: i32, %arg1: i32) -> (i32, i32) {
    %c0_i32 = arith.constant 0 : i32
    %c0_i32_0 = arith.constant 0 : i32
    %c0_i32_1 = arith.constant 0 : i32
    return %c0_i32, %c0_i32_0 : i32, i32
  }
  func.func @transform_5(%arg0: i32, %arg1: i32) -> (i32, i32) {
    %c0_i32 = arith.constant 0 : i32
    %c0_i32_0 = arith.constant 0 : i32
    return %arg0, %c0_i32 : i32, i32
  }
}

</mosaic_0001>

<bundles_post_ra>
// kernel: tpu_custom_call.1
= control target key start
LH: loop header
LB: loop body
LE: loop exit
PB: predicated region body
PF: predicated region fallthrough
CT: control target
= control target key end

     0   :  { %10 = vsyncpa [#allocation4], 0  ;;  %s645_s0 = inlined_call_operand.hbm [shape: bf16[16,128], index: 0, kind: input, shape index: {}]   ;;  %s646_s1 = inlined_call_operand.hbm [shape: bf16[128,128], index: 1, kind: input, shape index: {}]   ;;  %s647_s2 = inlined_call_operand.vmem [shape: f32[1,128], index: 2, kind: input, shape index: {}]   ;;  %s648_s3 = inlined_call_operand.hbm [shape: bf16[128,128], index: 3, kind: input, shape index: {}]   ;;  %s649_s4 = inlined_call_operand.vmem [shape: f32[1,128], index: 4, kind: input, shape index: {}]   ;;  %s650_s5 = inlined_call_operand.hbm [shape: f32[16,128], index: 5, kind: output, shape index: {}]  }
   0x1   :  { %11 = vsyncpa [#allocation7], 0 }
   0x2   :  { %12 = vsyncpa [#allocation5], 0  ;;  %s535_s18 = smov [#allocation6]   ;;  %s536_s20 = smov [#allocation3]  }
   0x3   :  { %s30_s19 = sshll.u32 %s535_s18, 4  ;;  %s18_s21 = sshll.u32 %s536_s20, 4  ;;  %s31_s19 = int_to_ptr.vmem [resolvable:$true] %s30_s19  ;;  %s575_s21 = int_to_ptr.vmem [resolvable:$true] %s18_s21 }
   0x4   :  { %s441_s24 = scalar_lea.hbm %s646_s1, 1024 }
   0x5   :  { %p442_p0 = scmp.ne.s32.totalorder %s646_s1, %s441_s24  ;;  %p445_p1 = scmp.lt.u32.totalorder %s441_s24, %s646_s1 }
   0x7   :  { %p447_p2 = pnand %p445_p1, %p442_p0 }
   0x9   :  { %450 = shalt.err (!%p447_p2)
}
   0xa   :  { %s451_s29 = scalar_lea.vmem %s31_s19, 1024  ;;  %p456_p4 = scmp.lt.s32.totalorder %s31_s19, %s31_s19 }
   0xb   :  { %p452_p3 = scmp.ne.s32.totalorder %s31_s19, %s451_s29  ;;  %p457_p5 = scmp.lt.s32.totalorder %s451_s29, %s451_s29 }
   0xd   :  { %p458_p6 = por %p457_p5, %p456_p4 }
   0xf   :  { %p459_p7 = pnand %p458_p6, %p452_p3 }
  0x11   :  { %462 = shalt.err (!%p459_p7)
}
  0x12   :  { %s537_s30 = smov 64   ;;  %s538_s6 = smov 4  }
  0x13   :  { %36 = dma.hbm_to_vmem [thread:$0]  %s646_s1, 1024, %s31_s19, [#allocation7], %s537_s30, %s537_s30, %s538_s6  }
  0x14   :  { %s463_s11 = scalar_lea.hbm %s645_s0, 128 }
  0x15   :  { %p464_p8 = scmp.ne.s32.totalorder %s645_s0, %s463_s11  ;;  %p467_p9 = scmp.lt.u32.totalorder %s463_s11, %s645_s0 }
  0x17   :  { %p469_p10 = pnand %p467_p9, %p464_p8 }
  0x19   :  { %472 = shalt.err (!%p469_p10)
}
  0x1a   :  { %s473_s16 = scalar_lea.vmem %s575_s21, 128  ;;  %p478_p12 = scmp.lt.s32.totalorder %s575_s21, %s575_s21 }
  0x1b   :  { %p474_p11 = scmp.ne.s32.totalorder %s575_s21, %s473_s16  ;;  %p479_p13 = scmp.lt.s32.totalorder %s473_s16, %s473_s16 }
  0x1d   :  { %p480_p0 = por %p479_p13, %p478_p12 }
  0x1f   :  { %p481_p1 = pnand %p480_p0, %p474_p11 }
  0x21   :  { %484 = shalt.err (!%p481_p1)
}
  0x22   :  { %24 = dma.hbm_to_vmem [thread:$0]  %s645_s0, 128, %s575_s21, [#allocation4], %s537_s30, %s537_s30, %s538_s6  }
  0x23   :  { %s539_s18 = smov [#allocation8]   ;;  %s485_s23 = scalar_lea.hbm %s648_s3, 1024 }
  0x24   :  { %s44_s19 = sshll.u32 %s539_s18, 4  ;;  %p486_p2 = scmp.ne.s32.totalorder %s648_s3, %s485_s23  ;;  %s45_s19 = int_to_ptr.vmem [resolvable:$true] %s44_s19 }
  0x25   :  { %p489_p3 = scmp.lt.u32.totalorder %s485_s23, %s648_s3 }
  0x27   :  { %p491_p4 = pnand %p489_p3, %p486_p2 }
  0x29   :  { %494 = shalt.err (!%p491_p4)
}
  0x2a   :  { %s495_s28 = scalar_lea.vmem %s45_s19, 1024  ;;  %p500_p6 = scmp.lt.s32.totalorder %s45_s19, %s45_s19 }
  0x2b   :  { %p496_p5 = scmp.ne.s32.totalorder %s45_s19, %s495_s28  ;;  %p501_p7 = scmp.lt.s32.totalorder %s495_s28, %s495_s28 }
  0x2d   :  { %p502_p8 = por %p501_p7, %p500_p6 }
  0x2f   :  { %p503_p9 = pnand %p502_p8, %p496_p5 }
  0x31   :  { %506 = shalt.err (!%p503_p9)
}
  0x32   :  { %50 = dma.hbm_to_vmem [thread:$0]  %s648_s3, 1024, %s45_s19, [#allocation7], %s537_s30, %s537_s30, %s538_s6  }
  0x33   :  { %529 = dma.done.wait [#allocation4], 128  }
  0x34   :  { %530 = vsyncadd [#allocation4], 4294967168 }
  0x35   :  { %531 = dma.done.wait [#allocation7], 2048  }
  0x36   :  { %532 = vsyncadd [#allocation7], 4294965248  ;;  %v540_v0 = vmov 0.0   ;;  %vm541_vm0 = vmmov 0   ;;  %v424_v1 = vld [vmem:[#allocation6] sm:$0xff]   ;;  %v425_v2 = vld [vmem:[#allocation6 + $0x8] sm:$0xff]  }
  0x37   :  { %374 = vmatprep.subr.bf16.mxu0 %v540_v0  ;;  %390 = vmatprep.mubr.msk.bf16.mxu0 %vm541_vm0, %v540_v0  ;;  %v426_v3 = vld [vmem:[#allocation6 + $0x10] sm:$0xff]   ;;  %v433_v4 = vld [vmem:[#allocation8] sm:$0xff]   ;;  %v427_v5 = vld [vmem:[#allocation6 + $0x18] sm:$0xff]   ;;  %s542_s7 = smov [#allocation9]  }
  0x38   :  { %394 = vmatprep.subr.bf16.mxu1 %v540_v0  ;;  %410 = vmatprep.mubr.msk.bf16.mxu1 %vm541_vm0, %v540_v0  ;;  %v434_v6 = vld [vmem:[#allocation8 + $0x8] sm:$0xff]   ;;  %v428_v7 = vld [vmem:[#allocation6 + $0x20] sm:$0xff]   ;;  %v435_v8 = vld [vmem:[#allocation8 + $0x10] sm:$0xff]   ;;  %s324_s8 = sshll.u32 %s542_s7, 4  ;;  %s325_s8 = int_to_ptr.vmem [resolvable:$true] %s324_s8 }
  0x39   :  { %375 = vmatpush3.bf16.msra.mxu0 %v424_v1  ;;  %395 = vmatpush3.bf16.msra.mxu1 %v433_v4  ;;  %v429_v9 = vld [vmem:[#allocation6 + $0x28] sm:$0xff]   ;;  %v436_v10 = vld [vmem:[#allocation8 + $0x18] sm:$0xff]   ;;  %v430_v11 = vld [vmem:[#allocation6 + $0x30] sm:$0xff]   ;;  %p512_p11 = scmp.lt.s32.totalorder %s325_s8, %s325_s8 }
  0x3a   :  { %376 = vmatprep.subr.bf16.mxu0 %v540_v0  ;;  %396 = vmatprep.subr.bf16.mxu1 %v540_v0  ;;  %v437_v12 = vld [vmem:[#allocation8 + $0x20] sm:$0xff]   ;;  %v431_v13 = vld [vmem:[#allocation6 + $0x38] sm:$0xff]   ;;  %v438_v14 = vld [vmem:[#allocation8 + $0x28] sm:$0xff]  }
  0x3b   :  { %v432_v15 = vld [vmem:[#allocation3] sm:$0xff]   ;;  %v439_v16 = vld [vmem:[#allocation8 + $0x30] sm:$0xff]  }
  0x3c   :  { %v440_v17 = vld [vmem:[#allocation8 + $0x38] sm:$0xff]  }
  0x3d   :  { %377 = vmatpush3.bf16.msra.mxu0 %v425_v2  ;;  %397 = vmatpush3.bf16.msra.mxu1 %v434_v6  ;;  %v337_v18 = vld [vmem:[%s647_s2] ss:$0 sm:$0xff]  ;;  %s507_s2 = scalar_lea.vmem %s325_s8, 256 }
  0x3e   :  { %378 = vmatprep.subr.bf16.mxu0 %v540_v0  ;;  %398 = vmatprep.subr.bf16.mxu1 %v540_v0  ;;  %v355_v28 = vld [vmem:[%s649_s4] ss:$0 sm:$0xff]  ;;  %p508_p10 = scmp.ne.s32.totalorder %s325_s8, %s507_s2  ;;  %p513_p12 = scmp.lt.s32.totalorder %s507_s2, %s507_s2 }
  0x40   :  { %p514_p13 = por %p513_p12, %p512_p11 }
  0x41   :  { %379 = vmatpush3.bf16.msra.mxu0 %v426_v3  ;;  %399 = vmatpush3.bf16.msra.mxu1 %v435_v8 }
  0x42   :  { %380 = vmatprep.subr.bf16.mxu0 %v540_v0  ;;  %400 = vmatprep.subr.bf16.mxu1 %v540_v0  ;;  %p515_p0 = pnand %p514_p13, %p508_p10 }
  0x45   :  { %381 = vmatpush3.bf16.msra.mxu0 %v427_v5  ;;  %401 = vmatpush3.bf16.msra.mxu1 %v436_v10 }
  0x46   :  { %382 = vmatprep.subr.bf16.mxu0 %v540_v0  ;;  %402 = vmatprep.subr.bf16.mxu1 %v540_v0 }
  0x49   :  { %383 = vmatpush3.bf16.msra.mxu0 %v428_v7  ;;  %403 = vmatpush3.bf16.msra.mxu1 %v437_v12 }
  0x4a   :  { %384 = vmatprep.subr.bf16.mxu0 %v540_v0  ;;  %404 = vmatprep.subr.bf16.mxu1 %v540_v0 }
  0x4d   :  { %385 = vmatpush3.bf16.msra.mxu0 %v429_v9  ;;  %405 = vmatpush3.bf16.msra.mxu1 %v438_v14 }
  0x4e   :  { %386 = vmatprep.subr.bf16.mxu0 %v540_v0  ;;  %406 = vmatprep.subr.bf16.mxu1 %v540_v0 }
  0x51   :  { %387 = vmatpush3.bf16.msra.mxu0 %v430_v11  ;;  %407 = vmatpush3.bf16.msra.mxu1 %v439_v16 }
  0x52   :  { %388 = vmatprep.subr.bf16.mxu0 %v540_v0  ;;  %408 = vmatprep.subr.bf16.mxu1 %v540_v0 }
  0x55   :  { %389 = vmatpush3.bf16.msra.mxu0 %v431_v13  ;;  %409 = vmatpush3.bf16.msra.mxu1 %v440_v17 }
  0x58   :  { %391 = vmatmul.mubr.bf16.vlgmr.msra.gmra.mrb[0].mxu0 %v432_v15 }
 0x12b   :  { %v182_v19 = vpop.f32.mrb[0].mxu0 }
 0x12c   :  { %v183_v20 = vadd.f32 %v337_v18, %v182_v19  ;;  %v392_v21 = vpop.f32.mrb[1].mxu0 }
 0x12d   :  { %v185_v22 = vpop.f32.mrb[2].mxu0 }
 0x12e   :  { %v186_v23 = vadd.f32 %v337_v18, %v185_v22  ;;  %v393_v24 = vpop.f32.mrb[3].mxu0  ;;  %v189_v25 = vmax.f32 %v183_v20, 0.0 }
 0x130   :  { %v190_v26 = vmax.f32 %v186_v23, 0.0 }
 0x132   :  { %v191_v27 = vpack.c.bf16 %v190_v26, %v189_v25 }
 0x134   :  { %411 = vmatmul.mubr.bf16.vlgmr.msra.gmra.mrb[0].mxu1 %v191_v27 }
 0x207   :  { %v292_v29 = vpop.f32.mrb[0].mxu1 }
 0x208   :  { %v315_v30 = vadd.f32 %v355_v28, %v292_v29  ;;  %v412_v31 = vpop.f32.mrb[1].mxu1 }
 0x209   :  { %v295_v32 = vpop.f32.mrb[2].mxu1 }
 0x20a   :  { %317 = vst [vmem:[#allocation9] sm:$0xff] %v315_v30  ;;  %v316_v33 = vadd.f32 %v355_v28, %v295_v32  ;;  %v413_v34 = vpop.f32.mrb[3].mxu1 }
 0x20c   :  { %318 = vst [vmem:[#allocation9 + $0x8] sm:$0xff] %v316_v33 }
 0x20d   :  { %518 = shalt.err (!%p515_p0)
}
 0x20e   :  { %s519_s10 = scalar_lea.hbm %s650_s5, 256 }
 0x20f   :  { %p520_p1 = scmp.ne.s32.totalorder %s650_s5, %s519_s10  ;;  %p523_p2 = scmp.lt.u32.totalorder %s519_s10, %s650_s5 }
 0x211   :  { %p525_p3 = pnand %p523_p2, %p520_p1 }
 0x213   :  { %528 = shalt.err (!%p525_p3)
}
 0x214   :  { %s543_s15 = smov 128   ;;  %s544_s16 = smov 8  }
 0x215   :  { %330 = dma.vmem_to_hbm [thread:$0]  %s325_s8, 256, %s650_s5, [#allocation5], %s543_s15, %s543_s15, %s544_s16  }
 0x216   :  { %533 = dma.done.wait [#allocation5], 256  }
 0x217   :  { %534 = vsyncadd [#allocation5], 4294967040 }
 0x218   :  { %334 = vsyncpa [#allocation4], 1 }
 0x219   :  { %335 = vsyncpa [#allocation7], 1 }
 0x21a   :  { %336 = vsyncpa [#allocation5], 1 }

</bundles_post_ra>
